<compile_context>
chip_gen: v7x
topology: tpu7x:2x2x1
jax: 0.10.0
libtpu: 0.0.40
codegen_flags: <defaults>
</compile_context>

<pallas_src>
import jax
import jax.numpy as jnp
from jax.experimental import pallas as pl
from jax.experimental.pallas import tpu as pltpu


def _relu_matmul_kernel(x_ref, w_ref, o_ref):
    # Lane-dense-output path.
    # x_ref: (t_m, C_in)   w_ref: (C_in, C_out)   o_ref: (t_m, C_out)
    x = jnp.maximum(x_ref[...], 0.0)                          # fused ReLU (VPU)
    o_ref[...] = jnp.dot(
        x, w_ref[...], preferred_element_type=jnp.float32     # 1x1 conv == matmul (MXU)
    ).astype(o_ref.dtype)


def _relu_conv1x1_nchw_kernel(x_ref, w_ref, o_ref):
    # NCHW-native path (lane axis = HW).
    # x_ref: (C_in, t_hw)   w_ref: (C_out, C_in)   o_ref: (C_out, t_hw)
    x = jnp.maximum(x_ref[...], 0.0)
    o_ref[...] = jnp.dot(
        w_ref[...], x, preferred_element_type=jnp.float32
    ).astype(o_ref.dtype)


def relu_conv1x1(
    x_nchw: jax.Array,
    weight_oihw: jax.Array,
    *,
    max_hw_tile: int = 2048,
    vmem_limit_bytes: int = 48 * 1024 * 1024,
) -> jax.Array:
    """ReLU followed by a 1x1 Conv2d (no bias), matching PyTorch semantics.

    x_nchw:      (N, C_in, H, W)      float32
    weight_oihw: (C_out, C_in, 1, 1)  float32 (PyTorch Conv2d weight layout)
    returns:     (N, C_out, H, W)     float32
    """
    n, c_in, h, w = x_nchw.shape
    c_out = weight_oihw.shape[0]
    hw = h * w
    w2d = weight_oihw.reshape(c_out, c_in)     # PyTorch OIHW -> (C_out, C_in), free reshape

    cost = pl.CostEstimate(
        flops=2 * n * hw * c_in * c_out,
        transcendentals=0,
        bytes_accessed=4 * (n * c_in * hw + c_out * c_in + n * c_out * hw),
    )

    if hw < 128:
        # ---------- lane-dense output path (HW smaller than the 128-wide lane axis) ----------
        # (N*HW, C_in) @ (C_in, C_out): batch folds into M, output last dim is C_out.
        # The small wrapper transposes cost < a few hundred KB in this regime.
        m = n * hw
        x_m = x_nchw.reshape(n, c_in, hw).transpose(0, 2, 1).reshape(m, c_in)
        w_t = w2d.T                                            # (C_in, C_out), tiny one-off

        t_m = m if m <= 1024 else 1024                         # full extent or 8-aligned tile
        grid = (pl.cdiv(m, t_m),)

        out_m = pl.pallas_call(
            _relu_matmul_kernel,
            out_shape=jax.ShapeDtypeStruct((m, c_out), jnp.float32),
            grid=grid,
            in_specs=[
                pl.BlockSpec((t_m, c_in), lambda i: (i, 0)),
                pl.BlockSpec((c_in, c_out), lambda i: (0, 0)),   # weight VMEM-resident
            ],
            out_specs=pl.BlockSpec((t_m, c_out), lambda i: (i, 0)),
            compiler_params=pltpu.CompilerParams(
                dimension_semantics=("parallel",),
                vmem_limit_bytes=vmem_limit_bytes,
            ),
            cost_estimate=cost,
        )(x_m, w_t)

        return out_m.reshape(n, hw, c_out).transpose(0, 2, 1).reshape(n, c_out, h, w)

    # ---------- NCHW-native path for large spatial extents ----------
    x3 = x_nchw.reshape(n, c_in, hw)                           # free, contiguous reshape

    # Double-buffered x & out tiles + weight + materialized ReLU temp, per step.
    def _footprint(t):
        return 4 * (2 * c_in * t + 2 * c_out * t + c_in * t + c_in * c_out)

    if hw <= max_hw_tile:
        t_hw = hw                                              # full-extent block
    else:
        t_hw = max_hw_tile                                     # multiple of 256
        while t_hw > 256 and _footprint(t_hw) > (vmem_limit_bytes * 3) // 4:
            t_hw //= 2
    g_hw = pl.cdiv(hw, t_hw)
    grid = (n, g_hw)

    out3 = pl.pallas_call(
        _relu_conv1x1_nchw_kernel,
        out_shape=jax.ShapeDtypeStruct((n, c_out, hw), jnp.float32),
        grid=grid,
        in_specs=[
            # per-(batch, hw-tile) activation slab; batch dim squeezed out of the kernel view
            pl.BlockSpec((None, c_in, t_hw), lambda b, j: (b, 0, j)),
            # weight stays resident in VMEM across the whole grid
            pl.BlockSpec((c_out, c_in), lambda b, j: (0, 0)),
        ],
        out_specs=pl.BlockSpec((None, c_out, t_hw), lambda b, j: (b, 0, j)),
        compiler_params=pltpu.CompilerParams(
            dimension_semantics=("parallel", "parallel"),
            vmem_limit_bytes=vmem_limit_bytes,
        ),
        cost_estimate=cost,
    )(x3, w2d)

    # Free reshape straight back to NCHW (no transpose on this path).
    return out3.reshape(n, c_out, h, w)


if __name__ == "__main__":
    key = jax.random.PRNGKey(0)
    kx, kw, kx2, kw2 = jax.random.split(key, 4)

    # ---- Shapes implied by the module: Conv2d(544 -> 128, 1x1), input (1, 544, 7, 7) ----
    x = jax.random.normal(kx, (1, 544, 7, 7), dtype=jnp.float32)
    weight = jax.random.normal(kw, (128, 544, 1, 1), dtype=jnp.float32) * 0.05

    out = jax.block_until_ready(relu_conv1x1(x, weight))
    ref = jnp.einsum("oc,nchw->nohw", weight.reshape(128, 544), jnp.maximum(x, 0.0))
    assert out.shape == (1, 128, 7, 7)
    assert jnp.allclose(out, ref, atol=1e-4, rtol=1e-4), float(jnp.max(jnp.abs(out - ref)))

    # ---- Also exercise the large-spatial (NCHW-native, hw >= 128) path ----
    x2 = jax.random.normal(kx2, (2, 64, 16, 16), dtype=jnp.float32)
    weight2 = jax.random.normal(kw2, (128, 64, 1, 1), dtype=jnp.float32) * 0.05
    out2 = jax.block_until_ready(relu_conv1x1(x2, weight2))
    ref2 = jnp.einsum("oc,nchw->nohw", weight2.reshape(128, 64), jnp.maximum(x2, 0.0))
    assert out2.shape == (2, 128, 16, 16)
    assert jnp.allclose(out2, ref2, atol=1e-4, rtol=1e-4), float(jnp.max(jnp.abs(out2 - ref2)))

    print("KERNEL_OK")
</pallas_src>

<mosaic_0001>
module attributes {stable_mosaic.version = 11 : i64} {
  func.func @_relu_matmul_kernel(%arg0: i32, %arg1: memref<49x544xf32, #tpu.memory_space<vmem>>, %arg2: memref<544x128xf32, #tpu.memory_space<vmem>>, %arg3: memref<49x128xf32, #tpu.memory_space<vmem>>) attributes {dimension_semantics = [#tpu.dimension_semantics<parallel>], iteration_bounds = array<i64: 1>, scalar_prefetch = 0 : i64, scratch_operands = 0 : i64, tpu.core_type = #tpu.core_type<tc>, window_params = [{transform_indices = @transform_0, window_bounds = array<i64: 49, 544>}, {pipeline_mode = #tpu.pipeline_mode<synchronous>, transform_indices = @transform_1, window_bounds = array<i64: 544, 128>}, {transform_indices = @transform_2, window_bounds = array<i64: 49, 128>}]} {
    %c0 = arith.constant 0 : index
    %c0_0 = arith.constant 0 : index
    %0 = vector.load %arg1[%c0, %c0_0] : memref<49x544xf32, #tpu.memory_space<vmem>>, vector<49x544xf32>
    %cst = arith.constant 0.000000e+00 : f32
    %1 = vector.broadcast %cst : f32 to vector<49x544xf32>
    %2 = arith.maximumf %0, %1 : vector<49x544xf32>
    %c0_1 = arith.constant 0 : index
    %c0_2 = arith.constant 0 : index
    %3 = vector.load %arg2[%c0_1, %c0_2] : memref<544x128xf32, #tpu.memory_space<vmem>>, vector<544x128xf32>
    %cst_3 = arith.constant dense<0.000000e+00> : vector<49x128xf32>
    %4 = tpu.matmul %2, %3, %cst_3 {dimension_numbers = #tpu.dot_dimension_numbers<[1], [0], [0], [1], [0, 0, 1, 1], [], []>} : vector<49x544xf32>, vector<544x128xf32>, vector<49x128xf32> -> vector<49x128xf32>
    %c0_4 = arith.constant 0 : index
    %c0_5 = arith.constant 0 : index
    %5 = vector.load %arg3[%c0_4, %c0_5] : memref<49x128xf32, #tpu.memory_space<vmem>>, vector<49x128xf32>
    tpu.vector_store %arg3[%c0_4, %c0_5], %4 {strides = array<i32>} : memref<49x128xf32, #tpu.memory_space<vmem>>, vector<49x128xf32>,
    return
  }
  func.func @transform_0(%arg0: i32) -> (i32, i32) {
    %c0_i32 = arith.constant 0 : i32
    %c0_i32_0 = arith.constant 0 : i32
    return %arg0, %c0_i32 : i32, i32
  }
  func.func @transform_1(%arg0: i32) -> (i32, i32) {
    %c0_i32 = arith.constant 0 : i32
    %c0_i32_0 = arith.constant 0 : i32
    %c0_i32_1 = arith.constant 0 : i32
    return %c0_i32, %c0_i32_0 : i32, i32
  }
  func.func @transform_2(%arg0: i32) -> (i32, i32) {
    %c0_i32 = arith.constant 0 : i32
    %c0_i32_0 = arith.constant 0 : i32
    return %arg0, %c0_i32 : i32, i32
  }
}

</mosaic_0001>

<bundles_post_ra>
// kernel: tpu_custom_call.1
= control target key start
LH: loop header
LB: loop body
LE: loop exit
PB: predicated region body
PF: predicated region fallthrough
CT: control target
= control target key end

     0   :  { %7 = vsyncpa [#allocation3], 0  ;;  %s915_s0 = inlined_call_operand.hbm [shape: f32[49,544], index: 0, kind: input, shape index: {}]   ;;  %s916_s1 = inlined_call_operand.hbm [shape: f32[544,128], index: 1, kind: input, shape index: {}]   ;;  %s917_s2 = inlined_call_operand.hbm [shape: f32[49,128], index: 2, kind: output, shape index: {}]  }
   0x1   :  { %8 = vsyncpa [#allocation6], 0 }
   0x2   :  { %9 = vsyncpa [#allocation4], 0  ;;  %s834_s9 = smov [#allocation2]   ;;  %s762_s13 = scalar_lea.hbm %s915_s0, 4480 }
   0x3   :  { %s15_s10 = sshll.u32 %s834_s9, 4  ;;  %p763_p0 = scmp.ne.s32.totalorder %s915_s0, %s762_s13  ;;  %s16_s10 = int_to_ptr.vmem [resolvable:$true] %s15_s10 }
   0x4   :  { %p766_p1 = scmp.lt.u32.totalorder %s762_s13, %s915_s0 }
   0x6   :  { %p768_p2 = pnand %p766_p1, %p763_p0 }
   0x8   :  { %771 = shalt.err (!%p768_p2)
}
   0x9   :  { %s772_s18 = scalar_lea.vmem %s16_s10, 4480  ;;  %p777_p4 = scmp.lt.s32.totalorder %s16_s10, %s16_s10 }
   0xa   :  { %p773_p3 = scmp.ne.s32.totalorder %s16_s10, %s772_s18  ;;  %p778_p5 = scmp.lt.s32.totalorder %s772_s18, %s772_s18 }
   0xc   :  { %p779_p6 = por %p778_p5, %p777_p4 }
   0xe   :  { %p780_p7 = pnand %p779_p6, %p773_p3 }
  0x10   :  { %783 = shalt.err (!%p780_p7)
}
  0x11   :  { %s835_s19 = smov 640   ;;  %s836_s20 = smov 40  }
  0x12   :  { %21 = dma.hbm_to_vmem [thread:$0]  %s915_s0, 4480, %s16_s10, [#allocation3], %s835_s19, %s835_s19, %s836_s20  }
  0x13   :  { %s837_s23 = smov [#allocation5]   ;;  %s784_s27 = scalar_lea.hbm %s916_s1, 8704 }
  0x14   :  { %s27_s24 = sshll.u32 %s837_s23, 4  ;;  %p785_p8 = scmp.ne.s32.totalorder %s916_s1, %s784_s27  ;;  %s28_s24 = int_to_ptr.vmem [resolvable:$true] %s27_s24 }
  0x15   :  { %p788_p9 = scmp.lt.u32.totalorder %s784_s27, %s916_s1 }
  0x17   :  { %p790_p10 = pnand %p788_p9, %p785_p8 }
  0x19   :  { %793 = shalt.err (!%p790_p10)
}
  0x1a   :  { %s794_s4 = scalar_lea.vmem %s28_s24, 8704  ;;  %p799_p12 = scmp.lt.s32.totalorder %s28_s24, %s28_s24 }
  0x1b   :  { %p795_p11 = scmp.ne.s32.totalorder %s28_s24, %s794_s4  ;;  %p800_p13 = scmp.lt.s32.totalorder %s794_s4, %s794_s4 }
  0x1d   :  { %p801_p0 = por %p800_p13, %p799_p12 }
  0x1f   :  { %p802_p1 = pnand %p801_p0, %p795_p11 }
  0x21   :  { %805 = shalt.err (!%p802_p1)
}
  0x22   :  { %s838_s0 = smov 128   ;;  %s839_s5 = smov 8  }
  0x23   :  { %33 = dma.hbm_to_vmem [thread:$0]  %s916_s1, 8704, %s28_s24, [#allocation6], %s838_s0, %s838_s0, %s839_s5  }
  0x24   :  { %828 = dma.done.wait [#allocation3], 4480  }
  0x25   :  { %829 = vsyncadd [#allocation3], 4294962816 }
  0x26   :  { %830 = dma.done.wait [#allocation6], 8704  }
  0x27   :  { %831 = vsyncadd [#allocation6], 4294958592  ;;  %v126_v0 = vld [vmem:[#allocation5 + $0x80] sm:$0xff]  ;;  %v127_v1 = vld [vmem:[#allocation5 + $0x88] sm:$0xff]  ;;  %vm841_vm0 = vmmov 0   ;;  %vm178_vm1 = vcmask 261120  }
  0x28   :  { %v158_v2 = vld [vmem:[#allocation5 + $0x180] sm:$0xff]  ;;  %v678_v3 = vpack.c.bf16 %v127_v1, %v126_v0  ;;  %v159_v4 = vld [vmem:[#allocation5 + $0x188] sm:$0xff]  ;;  %v128_v11 = vld [vmem:[#allocation5 + $0x90] sm:$0xff]  ;;  %s843_s1 = smov [#allocation7]  }
  0x29   :  { %v110_v5 = vld [vmem:[#allocation5] sm:$0xff]  ;;  %v111_v6 = vld [vmem:[#allocation5 + $0x8] sm:$0xff]  ;;  %v710_v7 = vpack.c.bf16 %v159_v4, %v158_v2  ;;  %v129_v13 = vld [vmem:[#allocation5 + $0x98] sm:$0xff]  ;;  %s512_s8 = sshll.u32 %s843_s1, 4  ;;  %s513_s8 = int_to_ptr.vmem [resolvable:$true] %s512_s8 }
  0x2a   :  { %v680_v8 = vpack.c.bf16 %v111_v6, %v110_v5  ;;  %v142_v9 = vld [vmem:[#allocation5 + $0x100] sm:$0xff]  ;;  %v143_v10 = vld [vmem:[#allocation5 + $0x108] sm:$0xff]  ;;  %679 = vmatprep.subr.bf16.mxu0 %v678_v3  ;;  %v160_v14 = vld [vmem:[#allocation5 + $0x190] sm:$0xff]  ;;  %v682_v16 = vpack.c.bf16 %v129_v13, %v128_v11  ;;  %s806_s9 = scalar_lea.vmem %s513_s8, 896  ;;  %p811_p3 = scmp.lt.s32.totalorder %s513_s8, %s513_s8 }
  0x2b   :  { %v712_v12 = vpack.c.bf16 %v143_v10, %v142_v9  ;;  %v161_v15 = vld [vmem:[#allocation5 + $0x198] sm:$0xff]  ;;  %711 = vmatprep.subr.bf16.mxu1 %v710_v7  ;;  %v112_v18 = vld [vmem:[#allocation5 + $0x10] sm:$0xff]  ;;  %v130_v23 = vld [vmem:[#allocation5 + $0xa0] sm:$0xff]  ;;  %p807_p2 = scmp.ne.s32.totalorder %s513_s8, %s806_s9  ;;  %p812_p4 = scmp.lt.s32.totalorder %s806_s9, %s806_s9 }
  0x2c   :  { %681 = vmatpush3.bf16.msra.mxu0 %v680_v8  ;;  %v714_v17 = vpack.c.bf16 %v161_v15, %v160_v14  ;;  %v113_v19 = vld [vmem:[#allocation5 + $0x18] sm:$0xff]  ;;  %v144_v20 = vld [vmem:[#allocation5 + $0x110] sm:$0xff]  ;;  %v131_v24 = vld [vmem:[#allocation5 + $0xa8] sm:$0xff] }
  0x2d   :  { %713 = vmatpush3.bf16.msra.mxu1 %v712_v12  ;;  %v684_v21 = vpack.c.bf16 %v113_v19, %v112_v18  ;;  %v145_v22 = vld [vmem:[#allocation5 + $0x118] sm:$0xff]  ;;  %683 = vmatprep.subr.bf16.mxu0 %v682_v16  ;;  %v686_v26 = vpack.c.bf16 %v131_v24, %v130_v23  ;;  %v162_v27 = vld [vmem:[#allocation5 + $0x1a0] sm:$0xff]  ;;  %v163_v28 = vld [vmem:[#allocation5 + $0x1a8] sm:$0xff]  ;;  %p813_p5 = por %p812_p4, %p811_p3 }
  0x2e   :  { %715 = vmatprep.subr.bf16.mxu1 %v714_v17  ;;  %v716_v25 = vpack.c.bf16 %v145_v22, %v144_v20  ;;  %v114_v29 = vld [vmem:[#allocation5 + $0x20] sm:$0xff]  ;;  %v718_v30 = vpack.c.bf16 %v163_v28, %v162_v27  ;;  %v115_v31 = vld [vmem:[#allocation5 + $0x28] sm:$0xff]  ;;  %v132_v35 = vld [vmem:[#allocation5 + $0xb0] sm:$0xff] }
  0x2f   :  { %v146_v32 = vld [vmem:[#allocation5 + $0x120] sm:$0xff]  ;;  %v147_v33 = vld [vmem:[#allocation5 + $0x128] sm:$0xff]  ;;  %v688_v34 = vpack.c.bf16 %v115_v31, %v114_v29  ;;  %v133_v36 = vld [vmem:[#allocation5 + $0xb8] sm:$0xff]  ;;  %p814_p6 = pnand %p813_p5, %p807_p2 }
  0x30   :  { %685 = vmatpush3.bf16.msra.mxu0 %v684_v21  ;;  %v164_v37 = vld [vmem:[#allocation5 + $0x1b0] sm:$0xff]  ;;  %v720_v38 = vpack.c.bf16 %v147_v33, %v146_v32  ;;  %v690_v39 = vpack.c.bf16 %v133_v36, %v132_v35  ;;  %v165_v40 = vld [vmem:[#allocation5 + $0x1b8] sm:$0xff]  ;;  %v134_v46 = vld [vmem:[#allocation5 + $0xc0] sm:$0xff] }
  0x31   :  { %717 = vmatpush3.bf16.msra.mxu1 %v716_v25  ;;  %687 = vmatprep.subr.bf16.mxu0 %v686_v26  ;;  %v116_v41 = vld [vmem:[#allocation5 + $0x30] sm:$0xff]  ;;  %v117_v42 = vld [vmem:[#allocation5 + $0x38] sm:$0xff]  ;;  %v722_v43 = vpack.c.bf16 %v165_v40, %v164_v37  ;;  %v135_v47 = vld [vmem:[#allocation5 + $0xc8] sm:$0xff] }
  0x32   :  { %719 = vmatprep.subr.bf16.mxu1 %v718_v30  ;;  %v148_v44 = vld [vmem:[#allocation5 + $0x130] sm:$0xff]  ;;  %v149_v45 = vld [vmem:[#allocation5 + $0x138] sm:$0xff]  ;;  %v166_v48 = vld [vmem:[#allocation5 + $0x1c0] sm:$0xff]  ;;  %v692_v50 = vpack.c.bf16 %v117_v42, %v116_v41  ;;  %v694_v52 = vpack.c.bf16 %v135_v47, %v134_v46  ;;  %v840_v46 = vmov 0.0|0.0  }
  0x33   :  { %v167_v49 = vld [vmem:[#allocation5 + $0x1c8] sm:$0xff]  ;;  %v724_v51 = vpack.c.bf16 %v149_v45, %v148_v44  ;;  %v118_v53 = vld [vmem:[#allocation5 + $0x40] sm:$0xff]  ;;  %v136_v58 = vld [vmem:[#allocation5 + $0xd0] sm:$0xff] }
  0x34   :  { %689 = vmatpush3.bf16.msra.mxu0 %v688_v34  ;;  %v119_v54 = vld [vmem:[#allocation5 + $0x48] sm:$0xff]  ;;  %v150_v55 = vld [vmem:[#allocation5 + $0x140] sm:$0xff]  ;;  %v726_v56 = vpack.c.bf16 %v167_v49, %v166_v48  ;;  %v137_v59 = vld [vmem:[#allocation5 + $0xd8] sm:$0xff] }
  0x35   :  { %721 = vmatpush3.bf16.msra.mxu1 %v720_v38  ;;  %691 = vmatprep.subr.bf16.mxu0 %v690_v39  ;;  %v151_v57 = vld [vmem:[#allocation5 + $0x148] sm:$0xff]  ;;  %v168_v60 = vld [vmem:[#allocation5 + $0x1d0] sm:$0xff]  ;;  %v169_v61 = vld [vmem:[#allocation5 + $0x1d8] sm:$0xff]  ;;  %v696_v62 = vpack.c.bf16 %v119_v54, %v118_v53  ;;  %v698_v0 = vpack.c.bf16 %v137_v59, %v136_v58 }
  0x36   :  { %723 = vmatprep.subr.bf16.mxu1 %v722_v43  ;;  %v728_v63 = vpack.c.bf16 %v151_v57, %v150_v55  ;;  %v120_v1 = vld [vmem:[#allocation5 + $0x50] sm:$0xff]  ;;  %v121_v2 = vld [vmem:[#allocation5 + $0x58] sm:$0xff]  ;;  %v730_v4 = vpack.c.bf16 %v169_v61, %v168_v60  ;;  %v138_v6 = vld [vmem:[#allocation5 + $0xe0] sm:$0xff] }
  0x37   :  { %v152_v3 = vld [vmem:[#allocation5 + $0x150] sm:$0xff]  ;;  %v153_v5 = vld [vmem:[#allocation5 + $0x158] sm:$0xff]  ;;  %v139_v7 = vld [vmem:[#allocation5 + $0xe8] sm:$0xff]  ;;  %v700_v10 = vpack.c.bf16 %v121_v2, %v120_v1 }
  0x38   :  { %693 = vmatpush3.bf16.msra.mxu0 %v692_v50  ;;  %v170_v8 = vld [vmem:[#allocation5 + $0x1e0] sm:$0xff]  ;;  %v171_v9 = vld [vmem:[#allocation5 + $0x1e8] sm:$0xff]  ;;  %v732_v13 = vpack.c.bf16 %v153_v5, %v152_v3  ;;  %v702_v14 = vpack.c.bf16 %v139_v7, %v138_v6  ;;  %v41_v16 = vld [vmem:[#allocation2 + $0x8] sm:$0xff] }
  0x39   :  { %725 = vmatpush3.bf16.msra.mxu1 %v724_v51  ;;  %695 = vmatprep.subr.bf16.mxu0 %v694_v52  ;;  %v122_v11 = vld [vmem:[#allocation5 + $0x60] sm:$0xff]  ;;  %v123_v12 = vld [vmem:[#allocation5 + $0x68] sm:$0xff]  ;;  %v734_v18 = vpack.c.bf16 %v171_v9, %v170_v8  ;;  %v140_v20 = vld [vmem:[#allocation5 + $0xf0] sm:$0xff]  ;;  %v76_v22 = vmax.f32 %v41_v16, 0.0 }
  0x3a   :  { %727 = vmatprep.subr.bf16.mxu1 %v726_v56  ;;  %v154_v15 = vld [vmem:[#allocation5 + $0x160] sm:$0xff]  ;;  %v155_v19 = vld [vmem:[#allocation5 + $0x168] sm:$0xff]  ;;  %v141_v21 = vld [vmem:[#allocation5 + $0xf8] sm:$0xff]  ;;  %v704_v26 = vpack.c.bf16 %v123_v12, %v122_v11 }
  0x3b   :  { %v43_v17 = vld [vmem:[#allocation2 + $0x18] sm:$0xff]  ;;  %v172_v24 = vld [vmem:[#allocation5 + $0x1f0] sm:$0xff]  ;;  %v173_v25 = vld [vmem:[#allocation5 + $0x1f8] sm:$0xff]  ;;  %264 = vmatprep.mubr.f32.mxu0 %v76_v22  ;;  %v736_v27 = vpack.c.bf16 %v155_v19, %v154_v15  ;;  %v706_v28 = vpack.c.bf16 %v141_v21, %v140_v20 }
  0x3c   :  { %697 = vmatpush3.bf16.msra.mxu0 %v696_v62  ;;  %v78_v23 = vmax.f32 %v43_v17, 0.0  ;;  %v124_v29 = vld [vmem:[#allocation5 + $0x70] sm:$0xff]  ;;  %v125_v30 = vld [vmem:[#allocation5 + $0x78] sm:$0xff]  ;;  %v738_v31 = vpack.c.bf16 %v173_v25, %v172_v24  ;;  %v40_v35 = vld [vmem:[#allocation2] sm:$0xff] }
  0x3d   :  { %729 = vmatpush3.bf16.msra.mxu1 %v728_v63  ;;  %699 = vmatprep.subr.bf16.mxu0 %v698_v0  ;;  %v156_v32 = vld [vmem:[#allocation5 + $0x170] sm:$0xff]  ;;  %v157_v33 = vld [vmem:[#allocation5 + $0x178] sm:$0xff]  ;;  %v708_v34 = vpack.c.bf16 %v125_v30, %v124_v29  ;;  %v174_v38 = vld [vmem:[#allocation5 + $0x200] sm:$0xff]  ;;  %v75_v42 = vmax.f32 %v40_v35, 0.0 }
  0x3e   :  { %731 = vmatprep.subr.bf16.mxu1 %v730_v4  ;;  %364 = vmatprep.mubr.f32.mxu1 %v78_v23  ;;  %v740_v36 = vpack.c.bf16 %v157_v33, %v156_v32  ;;  %v42_v37 = vld [vmem:[#allocation2 + $0x10] sm:$0xff]  ;;  %v175_v39 = vld [vmem:[#allocation5 + $0x208] sm:$0xff]  ;;  %v45_v45 = vld [vmem:[#allocation2 + $0x28] sm:$0xff] }
  0x3f   :  { %v46_v40 = vld [vmem:[#allocation2 + $0x30] sm:$0xff]  ;;  %v48_v41 = vld [vmem:[#allocation2 + $0x40] sm:$0xff]  ;;  %v77_v43 = vmax.f32 %v42_v37, 0.0  ;;  %v743_v44 = vpack.c.bf16 %v175_v39, %v174_v38  ;;  %v47_v49 = vld [vmem:[#allocation2 + $0x38] sm:$0xff]  ;;  %v80_v54 = vmax.f32 %v45_v45, 0.0 }
  0x40   :  { %701 = vmatpush3.bf16.msra.mxu0 %v700_v10  ;;  %v81_v47 = vmax.f32 %v46_v40, 0.0  ;;  %v83_v48 = vmax.f32 %v48_v41, 0.0  ;;  %v51_v50 = vld [vmem:[#allocation2 + $0x58] sm:$0xff]  ;;  %v53_v51 = vld [vmem:[#allocation2 + $0x68] sm:$0xff]  ;;  %v177_v53 = vld [vmem:[#allocation5 + $0x218] sm:$0xff]  ;;  %v82_v55 = vmax.f32 %v47_v49, 0.0 }
  0x41   :  { %733 = vmatpush3.bf16.msra.mxu1 %v732_v13  ;;  %703 = vmatprep.subr.bf16.mxu0 %v702_v14  ;;  %v176_v52 = vld [vmem:[#allocation5 + $0x210] sm:$0xff]  ;;  %v86_v56 = vmax.f32 %v51_v50, 0.0  ;;  %v50_v57 = vld [vmem:[#allocation2 + $0x50] sm:$0xff]  ;;  %v88_v58 = vmax.f32 %v53_v51, 0.0  ;;  %v52_v59 = vld [vmem:[#allocation2 + $0x60] sm:$0xff] }
  0x42   :  { %735 = vmatprep.subr.bf16.mxu1 %v734_v18  ;;  %v56_v60 = vld [vmem:[#allocation2 + $0x80] sm:$0xff]  ;;  %v746_v61 = vpack.c.bf16 %v177_v53, %v176_v52  ;;  %v58_v62 = vld [vmem:[#allocation2 + $0x90] sm:$0xff]  ;;  %v85_v63 = vmax.f32 %v50_v57, 0.0  ;;  %v87_v0 = vmax.f32 %v52_v59, 0.0  ;;  %v55_v2 = vld [vmem:[#allocation2 + $0x78] sm:$0xff] }
  0x43   :  { %v91_v1 = vmax.f32 %v56_v60, 0.0  ;;  %v93_v3 = vmax.f32 %v58_v62, 0.0  ;;  %v57_v4 = vld [vmem:[#allocation2 + $0x88] sm:$0xff]  ;;  %v63_v6 = vld [vmem:[#allocation2 + $0xb8] sm:$0xff]  ;;  %v90_v7 = vmax.f32 %v55_v2, 0.0  ;;  %v60_v10 = vld [vmem:[#allocation2 + $0xa0] sm:$0xff] }
  0x44   :  { %705 = vmatpush3.bf16.msra.mxu0 %v704_v26  ;;  %v61_v5 = vld [vmem:[#allocation2 + $0xa8] sm:$0xff]  ;;  %v92_v8 = vmax.f32 %v57_v4, 0.0  ;;  %v98_v11 = vmax.f32 %v63_v6, 0.0  ;;  %v62_v12 = vld [vmem:[#allocation2 + $0xb0] sm:$0xff]  ;;  %v68_v14 = vld [vmem:[#allocation2 + $0xe0] sm:$0xff]  ;;  %v95_v15 = vmax.f32 %v60_v10, 0.0 }
  0x45   :  { %737 = vmatpush3.bf16.msra.mxu1 %v736_v27  ;;  %707 = vmatprep.subr.bf16.mxu0 %v706_v28  ;;  %v96_v9 = vmax.f32 %v61_v5, 0.0  ;;  %v66_v13 = vld [vmem:[#allocation2 + $0xd0] sm:$0xff]  ;;  %v97_v16 = vmax.f32 %v62_v12, 0.0  ;;  %v65_v18 = vld [vmem:[#allocation2 + $0xc8] sm:$0xff]  ;;  %v103_v19 = vmax.f32 %v68_v14, 0.0  ;;  %v67_v20 = vld [vmem:[#allocation2 + $0xd8] sm:$0xff] }
  0x46   :  { %739 = vmatprep.subr.bf16.mxu1 %v738_v31  ;;  %v101_v17 = vmax.f32 %v66_v13, 0.0  ;;  %v71_v21 = vld [vmem:[#allocation2 + $0xf8] sm:$0x1]  ;;  %v73_v22 = vld [vmem:[#allocation2 + $0x108] sm:$0x1]  ;;  %v100_v23 = vmax.f32 %v65_v18, 0.0 }
  0x47   :  { %v102_v24 = vmax.f32 %v67_v20, 0.0  ;;  %v106_v25 = vmax.f32 %v71_v21, 0.0  ;;  %v70_v26 = vld [vmem:[#allocation2 + $0xf0] sm:$0x1]  ;;  %v108_v27 = vmax.f32 %v73_v22, 0.0  ;;  %v44_v31 = vld [vmem:[#allocation2 + $0x20] sm:$0xff] }
  0x48   :  { %709 = vmatpush3.bf16.msra.mxu0 %v708_v34  ;;  %v72_v28 = vld [vmem:[#allocation2 + $0x100] sm:$0x1]  ;;  %v105_v29 = vmax.f32 %v70_v26, 0.0  ;;  %v79_v33 = vmax.f32 %v44_v31, 0.0  ;;  %v842_v34 = vmov 0.0   ;;  %v69_v37 = vld [vmem:[#allocation2 + $0xe8] sm:$0xff] }
  0x49   :  { %741 = vmatpush3.bf16.msra.mxu1 %v740_v36  ;;  %742 = vmatprep.subr.bf16.mxu0 %v840_v46  ;;  %v107_v30 = vmax.f32 %v72_v28, 0.0  ;;  %v64_v32 = vld [vmem:[#allocation2 + $0xc0] sm:$0xff]  ;;  %v49_v36 = vld [vmem:[#allocation2 + $0x48] sm:$0xff]  ;;  %v104_v39 = vmax.f32 %v69_v37, 0.0  ;;  %v54_v40 = vld [vmem:[#allocation2 + $0x70] sm:$0xff] }
  0x4a   :  { %748 = vmatprep.subr.bf16.mxu1 %v840_v46  ;;  %v99_v35 = vmax.f32 %v64_v32, 0.0  ;;  %v84_v38 = vmax.f32 %v49_v36, 0.0  ;;  %v74_v41 = vld [vmem:[#allocation2 + $0x110] sm:$0x1] }
  0x4b   :  { %265 = vmatmul.mubr.f32.vlgmr.msra.gmra.mrb[0].mxu0 %v75_v42  ;;  %v89_v42 = vmax.f32 %v54_v40, 0.0 }
  0x4c   :  { %365 = vmatmul.mubr.f32.vlgmr.msra.gmra.mrb[0].mxu1 %v77_v43  ;;  %744 = vmatpush3.bf16.msra.mxu0 %v743_v44  ;;  %v109_v43 = vmax.f32 %v74_v41, 0.0 }
  0x4d   :  { %269 = vmatprep.mubr.f32.mxu0 %v81_v47  ;;  %369 = vmatprep.mubr.f32.mxu1 %v83_v48 }
  0x4e   :  { %750 = vmatpush3.bf16.msra.mxu1 %v743_v44  ;;  %745 = vmatprep.subr.bf16.mxu0 %v840_v46  ;;  %v59_v44 = vld [vmem:[#allocation2 + $0x98] sm:$0xff] }
  0x4f   :  { %270 = vmatmul.mubr.f32.gmra.mrb[2].mxu0 %v80_v54  ;;  %749 = vmatprep.subr.bf16.mxu1 %v840_v46  ;;  %v94_v45 = vmax.f32 %v59_v44, 0.0 }
  0x50   :  { %370 = vmatmul.mubr.f32.gmra.mrb[2].mxu1 %v82_v55  ;;  %274 = vmatprep.mubr.f32.mxu0 %v86_v56 }
  0x51   :  { %374 = vmatprep.mubr.f32.mxu1 %v88_v58  ;;  %747 = vmatpush3.bf16.msra.mxu0 %v746_v61 }
  0x52   :  { %751 = vmatpush3.bf16.msra.mxu1 %v746_v61 }
  0x53   :  { %275 = vmatmul.mubr.f32.gmra.mrb[4].mxu0 %v85_v63 }
  0x54   :  { %375 = vmatmul.mubr.f32.gmra.mrb[4].mxu1 %v87_v0  ;;  %279 = vmatprep.mubr.f32.mxu0 %v91_v1 }
  0x55   :  { %379 = vmatprep.mubr.f32.mxu1 %v93_v3 }
  0x57   :  { %280 = vmatmul.mubr.f32.gmra.mrb[6].mxu0 %v90_v7 }
  0x58   :  { %380 = vmatmul.mubr.f32.gmra.mrb[6].mxu1 %v92_v8  ;;  %284 = vmatprep.mubr.f32.mxu0 %v96_v9 }
  0x59   :  { %384 = vmatprep.mubr.f32.mxu1 %v98_v11 }
  0x5b   :  { %285 = vmatmul.mubr.f32.gmra.mrb[8].mxu0 %v95_v15 }
  0x5c   :  { %385 = vmatmul.mubr.f32.gmra.mrb[8].mxu1 %v97_v16  ;;  %289 = vmatprep.mubr.f32.mxu0 %v101_v17 }
  0x5d   :  { %389 = vmatprep.mubr.f32.mxu1 %v103_v19 }
  0x5f   :  { %290 = vmatmul.mubr.f32.gmra.mrb[10].mxu0 %v100_v23 }
  0x60   :  { %390 = vmatmul.mubr.f32.gmra.mrb[10].mxu1 %v102_v24  ;;  %294 = vmatprep.mubr.f32.mxu0 %v106_v25 }
  0x61   :  { %394 = vmatprep.mubr.f32.mxu1 %v108_v27 }
  0x63   :  { %295 = vmatmul.mubr.f32.gmra.mrb[12].mxu0 %v105_v29 }
  0x64   :  { %395 = vmatmul.mubr.f32.gmra.mrb[12].mxu1 %v107_v30  ;;  %657 = vmatprep.mubr.msk.f32.mxu0 %vm841_vm0, %v842_v34 }
  0x65   :  { %669 = vmatprep.mubr.msk.f32.mxu1 %vm841_vm0, %v842_v34 }
  0x67   :  { %658 = vmatmul.mubr.msk.f32.vlgmr.msra.gmra.mrb[14].mxu0 %vm178_vm1, %v79_v33 }
  0x68   :  { %670 = vmatmul.mubr.msk.f32.vlgmr.msra.gmra.mrb[14].mxu1 %vm178_vm1, %v99_v35  ;;  %660 = vmatprep.mubr.msk.f32.mxu0 %vm841_vm0, %v842_v34 }
  0x69   :  { %672 = vmatprep.mubr.msk.f32.mxu1 %vm841_vm0, %v842_v34 }
  0x6b   :  { %661 = vmatmul.mubr.msk.f32.gmra.mrb[16].mxu0 %vm178_vm1, %v84_v38 }
  0x6c   :  { %673 = vmatmul.mubr.msk.f32.gmra.mrb[16].mxu1 %vm178_vm1, %v104_v39  ;;  %663 = vmatprep.mubr.msk.f32.mxu0 %vm841_vm0, %v842_v34 }
  0x6d   :  { %675 = vmatprep.mubr.msk.f32.mxu1 %vm841_vm0, %v842_v34 }
  0x6f   :  { %664 = vmatmul.mubr.msk.f32.gmra.mrb[18].mxu0 %vm178_vm1, %v89_v42 }
  0x70   :  { %676 = vmatmul.mubr.msk.f32.gmra.mrb[18].mxu1 %vm178_vm1, %v109_v43  ;;  %666 = vmatprep.mubr.msk.f32.mxu0 %vm841_vm0, %v842_v34 }
  0x73   :  { %667 = vmatmul.mubr.msk.f32.gmra.mrb[20].mxu0 %vm178_vm1, %v94_v45 }
 0x11e   :  { %v564_v46 = vpop.f32.mrb[0].mxu0 }
 0x11f   :  { %v617_v47 = vpop.f32.mrb[0].mxu1  ;;  %v565_v48 = vpop.f32.mrb[1].mxu0 }
 0x120   :  { %v566_v49 = vadd.f32 %v565_v48, %v564_v46  ;;  %v618_v50 = vpop.f32.mrb[1].mxu1 }
 0x121   :  { %v619_v51 = vadd.f32 %v618_v50, %v617_v47 }
 0x122   :  { %v567_v52 = vpop.f32.mrb[2].mxu0 }
 0x123   :  { %v620_v53 = vpop.f32.mrb[2].mxu1  ;;  %v568_v54 = vpop.f32.mrb[3].mxu0  ;;  %v367_v55 = vadd.f32 %v619_v51, %v566_v49 }
 0x124   :  { %v569_v56 = vadd.f32 %v568_v54, %v567_v52  ;;  %v621_v57 = vpop.f32.mrb[3].mxu1 }
 0x125   :  { %v622_v58 = vadd.f32 %v621_v57, %v620_v53 }
 0x126   :  { %v570_v59 = vpop.f32.mrb[4].mxu0 }
 0x127   :  { %v623_v60 = vpop.f32.mrb[4].mxu1  ;;  %v571_v61 = vpop.f32.mrb[5].mxu0  ;;  %v372_v62 = vadd.f32 %v622_v58, %v569_v56 }
 0x128   :  { %v572_v63 = vadd.f32 %v571_v61, %v570_v59  ;;  %v624_v0 = vpop.f32.mrb[5].mxu1 }
 0x129   :  { %v625_v1 = vadd.f32 %v624_v0, %v623_v60 }
 0x12a   :  { %v573_v2 = vpop.f32.mrb[6].mxu0 }
 0x12b   :  { %v626_v3 = vpop.f32.mrb[6].mxu1  ;;  %v574_v4 = vpop.f32.mrb[7].mxu0  ;;  %v377_v5 = vadd.f32 %v625_v1, %v572_v63 }
 0x12c   :  { %v575_v6 = vadd.f32 %v574_v4, %v573_v2  ;;  %v627_v7 = vpop.f32.mrb[7].mxu1 }
 0x12d   :  { %v628_v8 = vadd.f32 %v627_v7, %v626_v3 }
 0x12e   :  { %v576_v9 = vpop.f32.mrb[8].mxu0 }
 0x12f   :  { %v629_v10 = vpop.f32.mrb[8].mxu1  ;;  %v577_v11 = vpop.f32.mrb[9].mxu0  ;;  %v382_v12 = vadd.f32 %v628_v8, %v575_v6 }
 0x130   :  { %v578_v13 = vadd.f32 %v577_v11, %v576_v9  ;;  %v630_v14 = vpop.f32.mrb[9].mxu1 }
 0x131   :  { %v631_v15 = vadd.f32 %v630_v14, %v629_v10 }
 0x132   :  { %v579_v16 = vpop.f32.mrb[10].mxu0 }
 0x133   :  { %v632_v17 = vpop.f32.mrb[10].mxu1  ;;  %v580_v18 = vpop.f32.mrb[11].mxu0  ;;  %v387_v19 = vadd.f32 %v631_v15, %v578_v13 }
 0x134   :  { %v581_v20 = vadd.f32 %v580_v18, %v579_v16  ;;  %v633_v21 = vpop.f32.mrb[11].mxu1 }
 0x135   :  { %v634_v22 = vadd.f32 %v633_v21, %v632_v17 }
 0x136   :  { %v582_v23 = vpop.f32.mrb[12].mxu0 }
 0x137   :  { %v635_v24 = vpop.f32.mrb[12].mxu1  ;;  %v583_v25 = vpop.f32.mrb[13].mxu0  ;;  %v392_v26 = vadd.f32 %v634_v22, %v581_v20 }
 0x138   :  { %v584_v27 = vadd.f32 %v583_v25, %v582_v23  ;;  %v636_v28 = vpop.f32.mrb[13].mxu1 }
 0x139   :  { %v637_v29 = vadd.f32 %v636_v28, %v635_v24 }
 0x13a   :  { %v466_v30 = vpop.f32.mrb[14].mxu0 }
 0x13b   :  { %v467_v31 = vadd.f32 %v466_v30, %v367_v55  ;;  %v486_v32 = vpop.f32.mrb[14].mxu1  ;;  %v659_v33 = vpop.f32.mrb[15].mxu0  ;;  %v397_v34 = vadd.f32 %v637_v29, %v584_v27 }
 0x13c   :  { %v487_v35 = vadd.f32 %v486_v32, %v387_v19  ;;  %v671_v36 = vpop.f32.mrb[15].mxu1 }
 0x13d   :  { %500 = vst [vmem:[#allocation7] sm:$0xff] %v467_v31 }
 0x13e   :  { %504 = vst [vmem:[#allocation7 + $0x20] sm:$0xff] %v487_v35  ;;  %v471_v37 = vpop.f32.mrb[16].mxu0 }
 0x13f   :  { %v472_v38 = vadd.f32 %v471_v37, %v372_v62  ;;  %v491_v39 = vpop.f32.mrb[16].mxu1  ;;  %v662_v40 = vpop.f32.mrb[17].mxu0 }
 0x140   :  { %v492_v41 = vadd.f32 %v491_v39, %v392_v26  ;;  %v674_v42 = vpop.f32.mrb[17].mxu1 }
 0x141   :  { %501 = vst [vmem:[#allocation7 + $0x8] sm:$0xff] %v472_v38 }
 0x142   :  { %505 = vst [vmem:[#allocation7 + $0x28] sm:$0xff] %v492_v41  ;;  %v476_v43 = vpop.f32.mrb[18].mxu0 }
 0x143   :  { %v477_v44 = vadd.f32 %v476_v43, %v377_v5  ;;  %v496_v45 = vpop.f32.mrb[18].mxu1  ;;  %v665_v46 = vpop.f32.mrb[19].mxu0 }
 0x144   :  { %v497_v47 = vadd.f32 %v496_v45, %v397_v34  ;;  %v677_v48 = vpop.f32.mrb[19].mxu1 }
 0x145   :  { %502 = vst [vmem:[#allocation7 + $0x10] sm:$0xff] %v477_v44 }
 0x146   :  { %506 = vst [vmem:[#allocation7 + $0x30] sm:$0x1] %v497_v47  ;;  %v481_v49 = vpop.f32.mrb[20].mxu0 }
 0x147   :  { %v482_v50 = vadd.f32 %v481_v49, %v382_v12  ;;  %v668_v51 = vpop.f32.mrb[21].mxu0 }
 0x149   :  { %503 = vst [vmem:[#allocation7 + $0x18] sm:$0xff] %v482_v50 }
 0x14a   :  { %817 = shalt.err (!%p814_p6)
}
 0x14b   :  { %s818_s12 = scalar_lea.hbm %s917_s2, 896 }
 0x14c   :  { %p819_p7 = scmp.ne.s32.totalorder %s917_s2, %s818_s12  ;;  %p822_p8 = scmp.lt.u32.totalorder %s818_s12, %s917_s2 }
 0x14e   :  { %p824_p9 = pnand %p822_p8, %p819_p7 }
 0x150   :  { %827 = shalt.err (!%p824_p9)
}
 0x151   :  { %518 = dma.vmem_to_hbm [thread:$0]  %s513_s8, 896, %s917_s2, [#allocation4], %s838_s0, %s838_s0, %s839_s5  }
 0x152   :  { %832 = dma.done.wait [#allocation4], 896  }
 0x153   :  { %833 = vsyncadd [#allocation4], 4294966400 }
 0x154   :  { %522 = vsyncpa [#allocation3], 1 }
 0x155   :  { %523 = vsyncpa [#allocation6], 1 }
 0x156   :  { %524 = vsyncpa [#allocation4], 1 }

</bundles_post_ra>
